<compile_context>
chip_gen: v7x
topology: tpu7x:2x2x1
jax: 0.10.0
libtpu: 0.0.40
codegen_flags: <defaults>
</compile_context>

<pallas_src>
import functools

import jax
import jax.numpy as jnp
from jax.experimental import pallas as pl
from jax.experimental.pallas import tpu as pltpu


# ----------------------------- fused kernel ---------------------------------

def _nextitnet_kernel(x_ref, w1_ref, b1_ref, g1_ref, be1_ref,
                      w2_ref, b2_ref, g2_ref, be2_ref, o_ref,
                      *, dilations, kernel_size, mm_dtype):
    """All residual blocks fused; activations stay resident in VMEM/vregs."""
    TB, L, C = x_ref.shape
    k = kernel_size
    R = TB * L

    # Row position within its own sequence (hoisted once, reused by every
    # conv's causal mask).  Flattened row r = b*L + t  ->  t = r % L.
    pos = jax.lax.broadcasted_iota(jnp.int32, (R, C), 0) % L

    def causal_conv(x2, w, b, dilation):
        # x2: (R, C) f32, w: (k*C, C) mm_dtype, b: (1, C) f32.
        # out[t] = b + sum_j x[t - (k-1-j)*d] @ w[j]   (zero where t < shift)
        # == PyTorch Conv2d(kernel=(1,k), dilation=d) on left-zero-padded input.
        taps = []
        for j in range(k):
            shift = (k - 1 - j) * dilation
            if shift == 0:
                t = x2
            elif shift >= L:
                t = jnp.zeros_like(x2)        # tap only ever sees left padding
            else:
                # Causal shift: XLU rotate + one VPU select.  Rolling the
                # flattened (TB*L) axis is safe: rows that wrap across a
                # sequence boundary are exactly the rows with t < shift,
                # which the mask zeroes.
                t = jnp.where(pos >= shift, pltpu.roll(x2, shift, axis=0), 0.0)
            taps.append(t.astype(mm_dtype))

        if C % 128 == 0:
            # Lane-aligned: single wide im2col matmul, contraction K = k*C.
            xk = jnp.concatenate(taps, axis=-1)                  # (R, k*C)
            y = jnp.dot(xk, w, preferred_element_type=jnp.float32)
        else:
            # Small / unaligned C: k MXU pushes, f32 accumulation.
            y = jnp.dot(taps[0], w[0:C, :], preferred_element_type=jnp.float32)
            for j in range(1, k):
                y = y + jnp.dot(taps[j], w[j * C:(j + 1) * C, :],
                                preferred_element_type=jnp.float32)
        return y + b

    def ln_relu(x2, g, be, eps=1e-5):
        # LN / ReLU / residual math stays f32 (v5e has no bf16 VPU/EUP).
        mu = jnp.mean(x2, axis=-1, keepdims=True)
        var = jnp.mean((x2 - mu) ** 2, axis=-1, keepdims=True)
        return jnp.maximum((x2 - mu) * jax.lax.rsqrt(var + eps) * g + be, 0.0)

    h = x_ref[...].astype(jnp.float32).reshape(R, C)
    # TODO(synk): for large n_blocks, move this loop onto an "arbitrary" grid
    # axis (per-block weight BlockSpecs + persistent VMEM accumulator) so only
    # ~2 blocks of weights are ever VMEM-resident (matters on v7x's 64 MiB).
    for bi, d in enumerate(dilations):           # static unroll over blocks
        res = h
        h1 = ln_relu(causal_conv(h, w1_ref[bi], b1_ref[bi], d),
                     g1_ref[bi], be1_ref[bi])
        h2 = ln_relu(causal_conv(h1, w2_ref[bi], b2_ref[bi], 2 * d),
                     g2_ref[bi], be2_ref[bi])
        h = res + h2

    # Only the last timestep is needed downstream -> L x fewer output bytes.
    o_ref[...] = h.reshape(TB, L, C)[:, L - 1:L, :].astype(o_ref.dtype)


# --------------------------- sizing heuristics -------------------------------

def _tpu_budget():
    """(vmem_limit_bytes, n_tensorcores), generation-aware with safe fallbacks."""
    phys = None
    cores = 1
    try:
        info = pltpu.get_tpu_info()
        for name in ("vmem_capacity_bytes", "vmem_bytes", "vmem_size_bytes"):
            v = getattr(info, name, None)
            if v:
                phys = int(v)
                break
        for name in ("num_cores", "core_count", "num_tensorcores"):
            v = getattr(info, name, None)
            if v:
                cores = int(v)
                break
    except Exception:   # off-TPU tracing / older jax: fall back conservatively
        pass
    if not phys:
        phys = 64 * 1024 * 1024          # conservative: v7x per-TC VMEM
    # Leave ~25% headroom for Mosaic internal scratch + I/O double buffers:
    # v5e/v6e (128 MiB) -> 96 MiB, v7x (64 MiB) -> 48 MiB.
    return max(32 * 1024 * 1024, (phys * 3) // 4), cores


def _pick_batch_tile(B, L, C, k, n_blocks, mm_bytes, vmem_limit_bytes, n_cores):
    """Largest batch tile whose working set fits the VMEM budget after
    subtracting the grid-invariant (double-buffered) weights; kept a divisor
    of B.  Only forces a split when there are multiple TensorCores."""
    weight_bytes = 2 * (2 * n_blocks * k * C * C * mm_bytes
                        + 6 * n_blocks * C * 4)
    budget = max(vmem_limit_bytes - weight_bytes - (8 << 20), 2 << 20)
    # f32 activations (x/res/h1/h2/LN temps) + mm_dtype taps/im2col + the
    # double-buffered f32 input block.
    per_row = L * C * (4 * 8 + mm_bytes * (2 * k + 1))
    tb = max(1, min(B, budget // max(per_row, 1)))
    if n_cores > 1 and tb >= B and B >= 2 * n_cores:
        tb = B // n_cores            # give every TensorCore at least one block
    while B % tb:                    # keep the grid exact (no ragged tile)
        tb -= 1
    return int(tb)


# ------------------------------ model wrapper --------------------------------

@functools.partial(jax.jit,
                   static_argnames=("dilations", "kernel_size", "mm_dtype",
                                    "batch_tile"))
def nextitnet_forward(x_ids, params, dilations, kernel_size,
                      mm_dtype=jnp.bfloat16, batch_tile=None):
    # TODO(synk): the nn.Embedding lookup (data-dependent row gather) stays in
    # plain JAX glue; it has no clean rectangular BlockSpec equivalent.
    emb = jnp.take(params["embedding"], x_ids, axis=0)        # (B, L, C) f32
    B, L, C = emb.shape
    k = kernel_size
    nb = len(dilations)
    mm_bytes = jnp.dtype(mm_dtype).itemsize

    # Stack per-block conv weights (k, Cin, Cout) -> (k*Cin, Cout), rows grouped
    # by tap, pre-cast to the MXU dtype (halves weight DMA + resident VMEM).
    def stack_w(name):
        return jnp.stack([blk[name].reshape(k * C, C)
                          for blk in params["blocks"]]).astype(mm_dtype)

    def stack_v(name):
        return jnp.stack([blk[name].reshape(1, C) for blk in params["blocks"]])

    W1, W2 = stack_w("w1"), stack_w("w2")                     # (nb, k*C, C)
    B1, G1, BE1 = stack_v("b1"), stack_v("g1"), stack_v("beta1")
    B2, G2, BE2 = stack_v("b2"), stack_v("g2"), stack_v("beta2")

    vmem_limit, n_cores = _tpu_budget()
    TB = batch_tile if batch_tile is not None else _pick_batch_tile(
        B, L, C, k, nb, mm_bytes, vmem_limit, n_cores)
    grid = (B // TB,)

    act_spec = pl.BlockSpec((TB, L, C), lambda b: (b, 0, 0))
    out_spec = pl.BlockSpec((TB, 1, C), lambda b: (b, 0, 0))
    # Full-array weight blocks with constant index maps: DMA'd once, not per
    # grid step.  (Single-buffering them via pl.Buffered(1) is a further VMEM
    # win for very deep configs.)
    const_spec = lambda a: pl.BlockSpec(a.shape, lambda b: (0, 0, 0))

    kern = functools.partial(_nextitnet_kernel, dilations=tuple(dilations),
                             kernel_size=k, mm_dtype=mm_dtype)

    out = pl.pallas_call(
        kern,
        out_shape=jax.ShapeDtypeStruct((B, 1, C), emb.dtype),
        grid_spec=pltpu.PrefetchScalarGridSpec(
            num_scalar_prefetch=0,
            grid=grid,
            in_specs=[act_spec] + [const_spec(a) for a in
                                   (W1, B1, G1, BE1, W2, B2, G2, BE2)],
            out_specs=out_spec,
        ),
        compiler_params=pltpu.CompilerParams(
            dimension_semantics=("parallel",),        # megacore-shard batch
            vmem_limit_bytes=int(vmem_limit),         # generation-aware limit
        ),
    )(emb, W1, B1, G1, BE1, W2, B2, G2, BE2)

    return out[:, 0, :]                                       # (B, C)


# --------------------------- pure-JAX reference ------------------------------

def _ref_conv(x, w, b, d, k, mm_dtype):
    B, L, C = x.shape
    pad = (k - 1) * d
    xp = jnp.pad(x, ((0, 0), (pad, 0), (0, 0)))
    out = jnp.zeros((B, L, C), jnp.float32) + b.reshape(1, 1, C)
    for j in range(k):
        out = out + jnp.einsum(
            "blc,co->blo",
            xp[:, j * d: j * d + L, :].astype(mm_dtype),
            w[j].astype(mm_dtype),
            preferred_element_type=jnp.float32)
    return out


def _ref_ln(x, g, be, eps=1e-5):
    mean = jnp.mean(x, axis=-1, keepdims=True)
    var = jnp.mean((x - mean) ** 2, axis=-1, keepdims=True)
    return ((x - mean) * jax.lax.rsqrt(var + eps) * g.reshape(1, 1, -1)
            + be.reshape(1, 1, -1))


def reference_forward(x_ids, params, dilations, kernel_size,
                      mm_dtype=jnp.float32):
    inputs = jnp.take(params["embedding"], x_ids, axis=0)
    for i, d in enumerate(dilations):
        blk = params["blocks"][i]
        ori = inputs
        h = _ref_conv(inputs, blk["w1"], blk["b1"], d, kernel_size, mm_dtype)
        h = jnp.maximum(_ref_ln(h, blk["g1"], blk["beta1"]), 0.0)
        h = _ref_conv(h, blk["w2"], blk["b2"], 2 * d, kernel_size, mm_dtype)
        h = jnp.maximum(_ref_ln(h, blk["g2"], blk["beta2"]), 0.0)
        inputs = ori + h
    return inputs[:, -1, :]


# ------------------------------ param init -----------------------------------

def init_params(key, input_size, state_size, kernel_size, dilations):
    C, k = state_size, kernel_size
    n_blocks = len(dilations)
    keys = jax.random.split(key, 1 + 8 * n_blocks)
    params = {
        "embedding": 0.1 * jax.random.normal(
            keys[0], (input_size + 1, C), jnp.float32),
        "blocks": [],
    }
    for i in range(n_blocks):
        kk = keys[1 + 8 * i: 1 + 8 * (i + 1)]
        blk = {
            "w1": 0.1 * jax.random.normal(kk[0], (k, C, C), jnp.float32),
            "b1": 0.05 * jax.random.normal(kk[1], (1, 1, C), jnp.float32),
            "g1": 1.0 + 0.1 * jax.random.normal(kk[2], (1, 1, C), jnp.float32),
            "beta1": 0.05 * jax.random.normal(kk[3], (1, 1, C), jnp.float32),
            "w2": 0.1 * jax.random.normal(kk[4], (k, C, C), jnp.float32),
            "b2": 0.05 * jax.random.normal(kk[5], (1, 1, C), jnp.float32),
            "g2": 1.0 + 0.1 * jax.random.normal(kk[6], (1, 1, C), jnp.float32),
            "beta2": 0.05 * jax.random.normal(kk[7], (1, 1, C), jnp.float32),
        }
        params["blocks"].append(blk)
    return params


# ---------------------------------- main --------------------------------------

if __name__ == "__main__":
    input_size = 50       # vocab size (embedding has input_size + 1 rows)
    state_size = 32       # C
    max_len = 8           # L
    dilations = (1, 2)
    kernel_size = 3
    B = 2

    key = jax.random.PRNGKey(0)
    kp, kx = jax.random.split(key)
    params = init_params(kp, input_size, state_size, kernel_size, dilations)
    x_ids = jax.random.randint(kx, (B, max_len), 0, input_size + 1,
                               dtype=jnp.int32)

    # 1) f32-MXU path: tight check of the roll/shift/LN/residual math.
    out_f32 = jax.block_until_ready(
        nextitnet_forward(x_ids, params, dilations, kernel_size,
                          mm_dtype=jnp.float32))
    ref_f32 = jax.block_until_ready(
        reference_forward(x_ids, params, dilations, kernel_size,
                          mm_dtype=jnp.float32))
    assert out_f32.shape == (B, state_size), out_f32.shape
    err32 = float(jnp.max(jnp.abs(out_f32 - ref_f32)))
    assert err32 < 2e-4, err32

    # 2) bf16-MXU path (default perf path), vs a bf16 reference.
    out_bf16 = jax.block_until_ready(
        nextitnet_forward(x_ids, params, dilations, kernel_size,
                          mm_dtype=jnp.bfloat16))
    ref_bf16 = jax.block_until_ready(
        reference_forward(x_ids, params, dilations, kernel_size,
                          mm_dtype=jnp.bfloat16))
    err16 = float(jnp.max(jnp.abs(out_bf16 - ref_bf16)))
    assert err16 < 1e-2, err16

    print("KERNEL_OK")
</pallas_src>

<mosaic_0001>
module attributes {stable_mosaic.version = 11 : i64} {
  func.func @_nextitnet_kernel(%arg0: i32, %arg1: memref<2x8x32xf32, #tpu.memory_space<vmem>>, %arg2: memref<2x96x32xf32, #tpu.memory_space<vmem>>, %arg3: memref<2x1x32xf32, #tpu.memory_space<vmem>>, %arg4: memref<2x1x32xf32, #tpu.memory_space<vmem>>, %arg5: memref<2x1x32xf32, #tpu.memory_space<vmem>>, %arg6: memref<2x96x32xf32, #tpu.memory_space<vmem>>, %arg7: memref<2x1x32xf32, #tpu.memory_space<vmem>>, %arg8: memref<2x1x32xf32, #tpu.memory_space<vmem>>, %arg9: memref<2x1x32xf32, #tpu.memory_space<vmem>>, %arg10: memref<2x1x32xf32, #tpu.memory_space<vmem>>) attributes {dimension_semantics = [#tpu.dimension_semantics<parallel>], iteration_bounds = array<i64: 1>, scalar_prefetch = 0 : i64, scratch_operands = 0 : i64, tpu.core_type = #tpu.core_type<tc>, window_params = [{transform_indices = @transform_0, window_bounds = array<i64: 2, 8, 32>}, {pipeline_mode = #tpu.pipeline_mode<synchronous>, transform_indices = @transform_1, window_bounds = array<i64: 2, 96, 32>}, {pipeline_mode = #tpu.pipeline_mode<synchronous>, transform_indices = @transform_2, window_bounds = array<i64: 2, 1, 32>}, {pipeline_mode = #tpu.pipeline_mode<synchronous>, transform_indices = @transform_3, window_bounds = array<i64: 2, 1, 32>}, {pipeline_mode = #tpu.pipeline_mode<synchronous>, transform_indices = @transform_4, window_bounds = array<i64: 2, 1, 32>}, {pipeline_mode = #tpu.pipeline_mode<synchronous>, transform_indices = @transform_5, window_bounds = array<i64: 2, 96, 32>}, {pipeline_mode = #tpu.pipeline_mode<synchronous>, transform_indices = @transform_6, window_bounds = array<i64: 2, 1, 32>}, {pipeline_mode = #tpu.pipeline_mode<synchronous>, transform_indices = @transform_7, window_bounds = array<i64: 2, 1, 32>}, {pipeline_mode = #tpu.pipeline_mode<synchronous>, transform_indices = @transform_8, window_bounds = array<i64: 2, 1, 32>}, {transform_indices = @transform_9, window_bounds = array<i64: 2, 1, 32>}]} {
    %0 = tpu.iota {dimensions = array<i32: 0>} : vector<16x32xi32>
    %c8_i32 = arith.constant 8 : i32
    %c0_i32 = arith.constant 0 : i32
    %1 = arith.cmpi eq, %c8_i32, %c0_i32 : i32
    %c1_i32 = arith.constant 1 : i32
    %2 = arith.select %1, %c1_i32, %c8_i32 : i32
    %3 = vector.broadcast %2 : i32 to vector<16x32xi32>
    %4 = arith.remsi %0, %3 : vector<16x32xi32>
    %c0_i32_0 = arith.constant 0 : i32
    %5 = vector.broadcast %c0_i32_0 : i32 to vector<16x32xi32>
    %6 = arith.cmpi ne, %4, %5 : vector<16x32xi32>
    %c0_i32_1 = arith.constant 0 : i32
    %7 = vector.broadcast %c0_i32_1 : i32 to vector<16x32xi32>
    %8 = arith.cmpi slt, %4, %7 : vector<16x32xi32>
    %c0_i32_2 = arith.constant 0 : i32
    %9 = arith.cmpi slt, %2, %c0_i32_2 : i32
    %10 = vector.broadcast %9 : i1 to vector<16x32xi1>
    %11 = vector.broadcast %10 : vector<16x32xi1> to vector<16x32xi1>
    %12 = arith.xori %8, %11 : vector<16x32xi1>
    %13 = arith.andi %12, %6 : vector<16x32xi1>
    %14 = vector.broadcast %2 : i32 to vector<16x32xi32>
    %15 = arith.addi %4, %14 : vector<16x32xi32>
    %16 = arith.select %13, %15, %4 : vector<16x32xi1>, vector<16x32xi32>
    %c0 = arith.constant 0 : index
    %c0_3 = arith.constant 0 : index
    %c0_4 = arith.constant 0 : index
    %17 = vector.load %arg1[%c0, %c0_3, %c0_4] : memref<2x8x32xf32, #tpu.memory_space<vmem>>, vector<2x8x32xf32>
    %18 = vector.shape_cast %17 : vector<2x8x32xf32> to vector<16x32xf32>
    %c0_5 = arith.constant 0 : index
    %c0_6 = arith.constant 0 : index
    %c0_7 = arith.constant 0 : index
    %19 = vector.load %arg2[%c0_5, %c0_6, %c0_7] : memref<2x96x32xf32, #tpu.memory_space<vmem>>, vector<1x96x32xf32>
    %20 = vector.shape_cast %19 : vector<1x96x32xf32> to vector<96x32xf32>
    %c0_8 = arith.constant 0 : index
    %c0_9 = arith.constant 0 : index
    %c0_10 = arith.constant 0 : index
    %21 = vector.load %arg3[%c0_8, %c0_9, %c0_10] : memref<2x1x32xf32, #tpu.memory_space<vmem>>, vector<1x1x32xf32>
    %22 = vector.shape_cast %21 : vector<1x1x32xf32> to vector<1x32xf32>
    %c2_i32 = arith.constant 2 : i32
    %23 = vector.broadcast %c2_i32 : i32 to vector<16x32xi32>
    %24 = arith.cmpi sge, %16, %23 : vector<16x32xi32>
    %c2_i32_11 = arith.constant 2 : i32
    %25 = tpu.dynamic_rotate %18 by %c2_i32_11 dim 0 : vector<16x32xf32>, i32 -> vector<16x32xf32>
    %cst = arith.constant 0.000000e+00 : f32
    %26 = vector.broadcast %cst : f32 to vector<16x32xf32>
    %27 = arith.select %24, %25, %26 : vector<16x32xi1>, vector<16x32xf32>
    %c1_i32_12 = arith.constant 1 : i32
    %28 = vector.broadcast %c1_i32_12 : i32 to vector<16x32xi32>
    %29 = arith.cmpi sge, %16, %28 : vector<16x32xi32>
    %c1_i32_13 = arith.constant 1 : i32
    %30 = tpu.dynamic_rotate %18 by %c1_i32_13 dim 0 : vector<16x32xf32>, i32 -> vector<16x32xf32>
    %cst_14 = arith.constant 0.000000e+00 : f32
    %31 = vector.broadcast %cst_14 : f32 to vector<16x32xf32>
    %32 = arith.select %29, %30, %31 : vector<16x32xi1>, vector<16x32xf32>
    %33 = vector.extract_strided_slice %20 {offsets = [0, 0], sizes = [32, 32], strides = [1, 1]} : vector<96x32xf32> to vector<32x32xf32>
    %cst_15 = arith.constant dense<0.000000e+00> : vector<16x32xf32>
    %34 = tpu.matmul %27, %33, %cst_15 {dimension_numbers = #tpu.dot_dimension_numbers<[1], [0], [0], [1], [0, 0, 1, 1], [], []>} : vector<16x32xf32>, vector<32x32xf32>, vector<16x32xf32> -> vector<16x32xf32>
    %35 = vector.extract_strided_slice %20 {offsets = [32, 0], sizes = [32, 32], strides = [1, 1]} : vector<96x32xf32> to vector<32x32xf32>
    %cst_16 = arith.constant dense<0.000000e+00> : vector<16x32xf32>
    %36 = tpu.matmul %32, %35, %cst_16 {dimension_numbers = #tpu.dot_dimension_numbers<[1], [0], [0], [1], [0, 0, 1, 1], [], []>} : vector<16x32xf32>, vector<32x32xf32>, vector<16x32xf32> -> vector<16x32xf32>
    %37 = arith.addf %34, %36 : vector<16x32xf32>
    %38 = vector.extract_strided_slice %20 {offsets = [64, 0], sizes = [32, 32], strides = [1, 1]} : vector<96x32xf32> to vector<32x32xf32>
    %cst_17 = arith.constant dense<0.000000e+00> : vector<16x32xf32>
    %39 = tpu.matmul %18, %38, %cst_17 {dimension_numbers = #tpu.dot_dimension_numbers<[1], [0], [0], [1], [0, 0, 1, 1], [], []>} : vector<16x32xf32>, vector<32x32xf32>, vector<16x32xf32> -> vector<16x32xf32>
    %40 = arith.addf %37, %39 : vector<16x32xf32>
    %41 = vector.broadcast %22 : vector<1x32xf32> to vector<16x32xf32>
    %42 = arith.addf %40, %41 : vector<16x32xf32>
    %c0_18 = arith.constant 0 : index
    %c0_19 = arith.constant 0 : index
    %c0_20 = arith.constant 0 : index
    %43 = vector.load %arg4[%c0_18, %c0_19, %c0_20] : memref<2x1x32xf32, #tpu.memory_space<vmem>>, vector<1x1x32xf32>
    %44 = vector.shape_cast %43 : vector<1x1x32xf32> to vector<1x32xf32>
    %c0_21 = arith.constant 0 : index
    %c0_22 = arith.constant 0 : index
    %c0_23 = arith.constant 0 : index
    %45 = vector.load %arg5[%c0_21, %c0_22, %c0_23] : memref<2x1x32xf32, #tpu.memory_space<vmem>>, vector<1x1x32xf32>
    %46 = vector.shape_cast %45 : vector<1x1x32xf32> to vector<1x32xf32>
    %cst_24 = arith.constant dense<0.000000e+00> : vector<16xf32>
    %47 = vector.multi_reduction <add>, %42, %cst_24 [1] : vector<16x32xf32> to vector<16xf32>
    %48 = vector.shape_cast %47 : vector<16xf32> to vector<16x1xf32>
    %cst_25 = arith.constant 3.200000e+01 : f32
    %49 = vector.broadcast %cst_25 : f32 to vector<16x1xf32>
    %50 = arith.divf %48, %49 : vector<16x1xf32>
    %51 = vector.broadcast %50 : vector<16x1xf32> to vector<16x32xf32>
    %52 = arith.subf %42, %51 : vector<16x32xf32>
    %53 = arith.mulf %52, %52 : vector<16x32xf32>
    %cst_26 = arith.constant dense<0.000000e+00> : vector<16xf32>
    %54 = vector.multi_reduction <add>, %53, %cst_26 [1] : vector<16x32xf32> to vector<16xf32>
    %55 = vector.shape_cast %54 : vector<16xf32> to vector<16x1xf32>
    %cst_27 = arith.constant 3.200000e+01 : f32
    %56 = vector.broadcast %cst_27 : f32 to vector<16x1xf32>
    %57 = arith.divf %55, %56 : vector<16x1xf32>
    %58 = vector.broadcast %50 : vector<16x1xf32> to vector<16x32xf32>
    %59 = arith.subf %42, %58 : vector<16x32xf32>
    %cst_28 = arith.constant 9.99999974E-6 : f32
    %60 = vector.broadcast %cst_28 : f32 to vector<16x1xf32>
    %61 = arith.addf %57, %60 : vector<16x1xf32>
    %62 = math.rsqrt %61 : vector<16x1xf32>
    %63 = vector.broadcast %62 : vector<16x1xf32> to vector<16x32xf32>
    %64 = arith.mulf %59, %63 : vector<16x32xf32>
    %65 = vector.broadcast %44 : vector<1x32xf32> to vector<16x32xf32>
    %66 = arith.mulf %64, %65 : vector<16x32xf32>
    %67 = vector.broadcast %46 : vector<1x32xf32> to vector<16x32xf32>
    %68 = arith.addf %66, %67 : vector<16x32xf32>
    %cst_29 = arith.constant 0.000000e+00 : f32
    %69 = vector.broadcast %cst_29 : f32 to vector<16x32xf32>
    %70 = arith.maximumf %68, %69 : vector<16x32xf32>
    %c0_30 = arith.constant 0 : index
    %c0_31 = arith.constant 0 : index
    %c0_32 = arith.constant 0 : index
    %71 = vector.load %arg6[%c0_30, %c0_31, %c0_32] : memref<2x96x32xf32, #tpu.memory_space<vmem>>, vector<1x96x32xf32>
    %72 = vector.shape_cast %71 : vector<1x96x32xf32> to vector<96x32xf32>
    %c0_33 = arith.constant 0 : index
    %c0_34 = arith.constant 0 : index
    %c0_35 = arith.constant 0 : index
    %73 = vector.load %arg7[%c0_33, %c0_34, %c0_35] : memref<2x1x32xf32, #tpu.memory_space<vmem>>, vector<1x1x32xf32>
    %74 = vector.shape_cast %73 : vector<1x1x32xf32> to vector<1x32xf32>
    %c4_i32 = arith.constant 4 : i32
    %75 = vector.broadcast %c4_i32 : i32 to vector<16x32xi32>
    %76 = arith.cmpi sge, %16, %75 : vector<16x32xi32>
    %c4_i32_36 = arith.constant 4 : i32
    %77 = tpu.dynamic_rotate %70 by %c4_i32_36 dim 0 : vector<16x32xf32>, i32 -> vector<16x32xf32>
    %cst_37 = arith.constant 0.000000e+00 : f32
    %78 = vector.broadcast %cst_37 : f32 to vector<16x32xf32>
    %79 = arith.select %76, %77, %78 : vector<16x32xi1>, vector<16x32xf32>
    %c2_i32_38 = arith.constant 2 : i32
    %80 = vector.broadcast %c2_i32_38 : i32 to vector<16x32xi32>
    %81 = arith.cmpi sge, %16, %80 : vector<16x32xi32>
    %c2_i32_39 = arith.constant 2 : i32
    %82 = tpu.dynamic_rotate %70 by %c2_i32_39 dim 0 : vector<16x32xf32>, i32 -> vector<16x32xf32>
    %cst_40 = arith.constant 0.000000e+00 : f32
    %83 = vector.broadcast %cst_40 : f32 to vector<16x32xf32>
    %84 = arith.select %81, %82, %83 : vector<16x32xi1>, vector<16x32xf32>
    %85 = vector.extract_strided_slice %72 {offsets = [0, 0], sizes = [32, 32], strides = [1, 1]} : vector<96x32xf32> to vector<32x32xf32>
    %cst_41 = arith.constant dense<0.000000e+00> : vector<16x32xf32>
    %86 = tpu.matmul %79, %85, %cst_41 {dimension_numbers = #tpu.dot_dimension_numbers<[1], [0], [0], [1], [0, 0, 1, 1], [], []>} : vector<16x32xf32>, vector<32x32xf32>, vector<16x32xf32> -> vector<16x32xf32>
    %87 = vector.extract_strided_slice %72 {offsets = [32, 0], sizes = [32, 32], strides = [1, 1]} : vector<96x32xf32> to vector<32x32xf32>
    %cst_42 = arith.constant dense<0.000000e+00> : vector<16x32xf32>
    %88 = tpu.matmul %84, %87, %cst_42 {dimension_numbers = #tpu.dot_dimension_numbers<[1], [0], [0], [1], [0, 0, 1, 1], [], []>} : vector<16x32xf32>, vector<32x32xf32>, vector<16x32xf32> -> vector<16x32xf32>
    %89 = arith.addf %86, %88 : vector<16x32xf32>
    %90 = vector.extract_strided_slice %72 {offsets = [64, 0], sizes = [32, 32], strides = [1, 1]} : vector<96x32xf32> to vector<32x32xf32>
    %cst_43 = arith.constant dense<0.000000e+00> : vector<16x32xf32>
    %91 = tpu.matmul %70, %90, %cst_43 {dimension_numbers = #tpu.dot_dimension_numbers<[1], [0], [0], [1], [0, 0, 1, 1], [], []>} : vector<16x32xf32>, vector<32x32xf32>, vector<16x32xf32> -> vector<16x32xf32>
    %92 = arith.addf %89, %91 : vector<16x32xf32>
    %93 = vector.broadcast %74 : vector<1x32xf32> to vector<16x32xf32>
    %94 = arith.addf %92, %93 : vector<16x32xf32>
    %c0_44 = arith.constant 0 : index
    %c0_45 = arith.constant 0 : index
    %c0_46 = arith.constant 0 : index
    %95 = vector.load %arg8[%c0_44, %c0_45, %c0_46] : memref<2x1x32xf32, #tpu.memory_space<vmem>>, vector<1x1x32xf32>
    %96 = vector.shape_cast %95 : vector<1x1x32xf32> to vector<1x32xf32>
    %c0_47 = arith.constant 0 : index
    %c0_48 = arith.constant 0 : index
    %c0_49 = arith.constant 0 : index
    %97 = vector.load %arg9[%c0_47, %c0_48, %c0_49] : memref<2x1x32xf32, #tpu.memory_space<vmem>>, vector<1x1x32xf32>
    %98 = vector.shape_cast %97 : vector<1x1x32xf32> to vector<1x32xf32>
    %cst_50 = arith.constant dense<0.000000e+00> : vector<16xf32>
    %99 = vector.multi_reduction <add>, %94, %cst_50 [1] : vector<16x32xf32> to vector<16xf32>
    %100 = vector.shape_cast %99 : vector<16xf32> to vector<16x1xf32>
    %cst_51 = arith.constant 3.200000e+01 : f32
    %101 = vector.broadcast %cst_51 : f32 to vector<16x1xf32>
    %102 = arith.divf %100, %101 : vector<16x1xf32>
    %103 = vector.broadcast %102 : vector<16x1xf32> to vector<16x32xf32>
    %104 = arith.subf %94, %103 : vector<16x32xf32>
    %105 = arith.mulf %104, %104 : vector<16x32xf32>
    %cst_52 = arith.constant dense<0.000000e+00> : vector<16xf32>
    %106 = vector.multi_reduction <add>, %105, %cst_52 [1] : vector<16x32xf32> to vector<16xf32>
    %107 = vector.shape_cast %106 : vector<16xf32> to vector<16x1xf32>
    %cst_53 = arith.constant 3.200000e+01 : f32
    %108 = vector.broadcast %cst_53 : f32 to vector<16x1xf32>
    %109 = arith.divf %107, %108 : vector<16x1xf32>
    %110 = vector.broadcast %102 : vector<16x1xf32> to vector<16x32xf32>
    %111 = arith.subf %94, %110 : vector<16x32xf32>
    %cst_54 = arith.constant 9.99999974E-6 : f32
    %112 = vector.broadcast %cst_54 : f32 to vector<16x1xf32>
    %113 = arith.addf %109, %112 : vector<16x1xf32>
    %114 = math.rsqrt %113 : vector<16x1xf32>
    %115 = vector.broadcast %114 : vector<16x1xf32> to vector<16x32xf32>
    %116 = arith.mulf %111, %115 : vector<16x32xf32>
    %117 = vector.broadcast %96 : vector<1x32xf32> to vector<16x32xf32>
    %118 = arith.mulf %116, %117 : vector<16x32xf32>
    %119 = vector.broadcast %98 : vector<1x32xf32> to vector<16x32xf32>
    %120 = arith.addf %118, %119 : vector<16x32xf32>
    %cst_55 = arith.constant 0.000000e+00 : f32
    %121 = vector.broadcast %cst_55 : f32 to vector<16x32xf32>
    %122 = arith.maximumf %120, %121 : vector<16x32xf32>
    %123 = arith.addf %18, %122 : vector<16x32xf32>
    %c1 = arith.constant 1 : index
    %c0_56 = arith.constant 0 : index
    %c0_57 = arith.constant 0 : index
    %124 = vector.load %arg2[%c1, %c0_56, %c0_57] : memref<2x96x32xf32, #tpu.memory_space<vmem>>, vector<1x96x32xf32>
    %125 = vector.shape_cast %124 : vector<1x96x32xf32> to vector<96x32xf32>
    %c1_58 = arith.constant 1 : index
    %c0_59 = arith.constant 0 : index
    %c0_60 = arith.constant 0 : index
    %126 = vector.load %arg3[%c1_58, %c0_59, %c0_60] : memref<2x1x32xf32, #tpu.memory_space<vmem>>, vector<1x1x32xf32>
    %127 = vector.shape_cast %126 : vector<1x1x32xf32> to vector<1x32xf32>
    %c4_i32_61 = arith.constant 4 : i32
    %128 = vector.broadcast %c4_i32_61 : i32 to vector<16x32xi32>
    %129 = arith.cmpi sge, %16, %128 : vector<16x32xi32>
    %c4_i32_62 = arith.constant 4 : i32
    %130 = tpu.dynamic_rotate %123 by %c4_i32_62 dim 0 : vector<16x32xf32>, i32 -> vector<16x32xf32>
    %cst_63 = arith.constant 0.000000e+00 : f32
    %131 = vector.broadcast %cst_63 : f32 to vector<16x32xf32>
    %132 = arith.select %129, %130, %131 : vector<16x32xi1>, vector<16x32xf32>
    %c2_i32_64 = arith.constant 2 : i32
    %133 = vector.broadcast %c2_i32_64 : i32 to vector<16x32xi32>
    %134 = arith.cmpi sge, %16, %133 : vector<16x32xi32>
    %c2_i32_65 = arith.constant 2 : i32
    %135 = tpu.dynamic_rotate %123 by %c2_i32_65 dim 0 : vector<16x32xf32>, i32 -> vector<16x32xf32>
    %cst_66 = arith.constant 0.000000e+00 : f32
    %136 = vector.broadcast %cst_66 : f32 to vector<16x32xf32>
    %137 = arith.select %134, %135, %136 : vector<16x32xi1>, vector<16x32xf32>
    %138 = vector.extract_strided_slice %125 {offsets = [0, 0], sizes = [32, 32], strides = [1, 1]} : vector<96x32xf32> to vector<32x32xf32>
    %cst_67 = arith.constant dense<0.000000e+00> : vector<16x32xf32>
    %139 = tpu.matmul %132, %138, %cst_67 {dimension_numbers = #tpu.dot_dimension_numbers<[1], [0], [0], [1], [0, 0, 1, 1], [], []>} : vector<16x32xf32>, vector<32x32xf32>, vector<16x32xf32> -> vector<16x32xf32>
    %140 = vector.extract_strided_slice %125 {offsets = [32, 0], sizes = [32, 32], strides = [1, 1]} : vector<96x32xf32> to vector<32x32xf32>
    %cst_68 = arith.constant dense<0.000000e+00> : vector<16x32xf32>
    %141 = tpu.matmul %137, %140, %cst_68 {dimension_numbers = #tpu.dot_dimension_numbers<[1], [0], [0], [1], [0, 0, 1, 1], [], []>} : vector<16x32xf32>, vector<32x32xf32>, vector<16x32xf32> -> vector<16x32xf32>
    %142 = arith.addf %139, %141 : vector<16x32xf32>
    %143 = vector.extract_strided_slice %125 {offsets = [64, 0], sizes = [32, 32], strides = [1, 1]} : vector<96x32xf32> to vector<32x32xf32>
    %cst_69 = arith.constant dense<0.000000e+00> : vector<16x32xf32>
    %144 = tpu.matmul %123, %143, %cst_69 {dimension_numbers = #tpu.dot_dimension_numbers<[1], [0], [0], [1], [0, 0, 1, 1], [], []>} : vector<16x32xf32>, vector<32x32xf32>, vector<16x32xf32> -> vector<16x32xf32>
    %145 = arith.addf %142, %144 : vector<16x32xf32>
    %146 = vector.broadcast %127 : vector<1x32xf32> to vector<16x32xf32>
    %147 = arith.addf %145, %146 : vector<16x32xf32>
    %c1_70 = arith.constant 1 : index
    %c0_71 = arith.constant 0 : index
    %c0_72 = arith.constant 0 : index
    %148 = vector.load %arg4[%c1_70, %c0_71, %c0_72] : memref<2x1x32xf32, #tpu.memory_space<vmem>>, vector<1x1x32xf32>
    %149 = vector.shape_cast %148 : vector<1x1x32xf32> to vector<1x32xf32>
    %c1_73 = arith.constant 1 : index
    %c0_74 = arith.constant 0 : index
    %c0_75 = arith.constant 0 : index
    %150 = vector.load %arg5[%c1_73, %c0_74, %c0_75] : memref<2x1x32xf32, #tpu.memory_space<vmem>>, vector<1x1x32xf32>
    %151 = vector.shape_cast %150 : vector<1x1x32xf32> to vector<1x32xf32>
    %cst_76 = arith.constant dense<0.000000e+00> : vector<16xf32>
    %152 = vector.multi_reduction <add>, %147, %cst_76 [1] : vector<16x32xf32> to vector<16xf32>
    %153 = vector.shape_cast %152 : vector<16xf32> to vector<16x1xf32>
    %cst_77 = arith.constant 3.200000e+01 : f32
    %154 = vector.broadcast %cst_77 : f32 to vector<16x1xf32>
    %155 = arith.divf %153, %154 : vector<16x1xf32>
    %156 = vector.broadcast %155 : vector<16x1xf32> to vector<16x32xf32>
    %157 = arith.subf %147, %156 : vector<16x32xf32>
    %158 = arith.mulf %157, %157 : vector<16x32xf32>
    %cst_78 = arith.constant dense<0.000000e+00> : vector<16xf32>
    %159 = vector.multi_reduction <add>, %158, %cst_78 [1] : vector<16x32xf32> to vector<16xf32>
    %160 = vector.shape_cast %159 : vector<16xf32> to vector<16x1xf32>
    %cst_79 = arith.constant 3.200000e+01 : f32
    %161 = vector.broadcast %cst_79 : f32 to vector<16x1xf32>
    %162 = arith.divf %160, %161 : vector<16x1xf32>
    %163 = vector.broadcast %155 : vector<16x1xf32> to vector<16x32xf32>
    %164 = arith.subf %147, %163 : vector<16x32xf32>
    %cst_80 = arith.constant 9.99999974E-6 : f32
    %165 = vector.broadcast %cst_80 : f32 to vector<16x1xf32>
    %166 = arith.addf %162, %165 : vector<16x1xf32>
    %167 = math.rsqrt %166 : vector<16x1xf32>
    %168 = vector.broadcast %167 : vector<16x1xf32> to vector<16x32xf32>
    %169 = arith.mulf %164, %168 : vector<16x32xf32>
    %170 = vector.broadcast %149 : vector<1x32xf32> to vector<16x32xf32>
    %171 = arith.mulf %169, %170 : vector<16x32xf32>
    %172 = vector.broadcast %151 : vector<1x32xf32> to vector<16x32xf32>
    %173 = arith.addf %171, %172 : vector<16x32xf32>
    %cst_81 = arith.constant 0.000000e+00 : f32
    %174 = vector.broadcast %cst_81 : f32 to vector<16x32xf32>
    %175 = arith.maximumf %173, %174 : vector<16x32xf32>
    %c1_82 = arith.constant 1 : index
    %c0_83 = arith.constant 0 : index
    %c0_84 = arith.constant 0 : index
    %176 = vector.load %arg6[%c1_82, %c0_83, %c0_84] : memref<2x96x32xf32, #tpu.memory_space<vmem>>, vector<1x96x32xf32>
    %177 = vector.shape_cast %176 : vector<1x96x32xf32> to vector<96x32xf32>
    %c1_85 = arith.constant 1 : index
    %c0_86 = arith.constant 0 : index
    %c0_87 = arith.constant 0 : index
    %178 = vector.load %arg7[%c1_85, %c0_86, %c0_87] : memref<2x1x32xf32, #tpu.memory_space<vmem>>, vector<1x1x32xf32>
    %179 = vector.shape_cast %178 : vector<1x1x32xf32> to vector<1x32xf32>
    %cst_88 = arith.constant 0.000000e+00 : f32
    %180 = vector.broadcast %cst_88 : f32 to vector<16x32xf32>
    %c4_i32_89 = arith.constant 4 : i32
    %181 = vector.broadcast %c4_i32_89 : i32 to vector<16x32xi32>
    %182 = arith.cmpi sge, %16, %181 : vector<16x32xi32>
    %c4_i32_90 = arith.constant 4 : i32
    %183 = tpu.dynamic_rotate %175 by %c4_i32_90 dim 0 : vector<16x32xf32>, i32 -> vector<16x32xf32>
    %cst_91 = arith.constant 0.000000e+00 : f32
    %184 = vector.broadcast %cst_91 : f32 to vector<16x32xf32>
    %185 = arith.select %182, %183, %184 : vector<16x32xi1>, vector<16x32xf32>
    %186 = vector.extract_strided_slice %177 {offsets = [0, 0], sizes = [32, 32], strides = [1, 1]} : vector<96x32xf32> to vector<32x32xf32>
    %cst_92 = arith.constant dense<0.000000e+00> : vector<16x32xf32>
    %187 = tpu.matmul %180, %186, %cst_92 {dimension_numbers = #tpu.dot_dimension_numbers<[1], [0], [0], [1], [0, 0, 1, 1], [], []>} : vector<16x32xf32>, vector<32x32xf32>, vector<16x32xf32> -> vector<16x32xf32>
    %188 = vector.extract_strided_slice %177 {offsets = [32, 0], sizes = [32, 32], strides = [1, 1]} : vector<96x32xf32> to vector<32x32xf32>
    %cst_93 = arith.constant dense<0.000000e+00> : vector<16x32xf32>
    %189 = tpu.matmul %185, %188, %cst_93 {dimension_numbers = #tpu.dot_dimension_numbers<[1], [0], [0], [1], [0, 0, 1, 1], [], []>} : vector<16x32xf32>, vector<32x32xf32>, vector<16x32xf32> -> vector<16x32xf32>
    %190 = arith.addf %187, %189 : vector<16x32xf32>
    %191 = vector.extract_strided_slice %177 {offsets = [64, 0], sizes = [32, 32], strides = [1, 1]} : vector<96x32xf32> to vector<32x32xf32>
    %cst_94 = arith.constant dense<0.000000e+00> : vector<16x32xf32>
    %192 = tpu.matmul %175, %191, %cst_94 {dimension_numbers = #tpu.dot_dimension_numbers<[1], [0], [0], [1], [0, 0, 1, 1], [], []>} : vector<16x32xf32>, vector<32x32xf32>, vector<16x32xf32> -> vector<16x32xf32>
    %193 = arith.addf %190, %192 : vector<16x32xf32>
    %194 = vector.broadcast %179 : vector<1x32xf32> to vector<16x32xf32>
    %195 = arith.addf %193, %194 : vector<16x32xf32>
    %c1_95 = arith.constant 1 : index
    %c0_96 = arith.constant 0 : index
    %c0_97 = arith.constant 0 : index
    %196 = vector.load %arg8[%c1_95, %c0_96, %c0_97] : memref<2x1x32xf32, #tpu.memory_space<vmem>>, vector<1x1x32xf32>
    %197 = vector.shape_cast %196 : vector<1x1x32xf32> to vector<1x32xf32>
    %c1_98 = arith.constant 1 : index
    %c0_99 = arith.constant 0 : index
    %c0_100 = arith.constant 0 : index
    %198 = vector.load %arg9[%c1_98, %c0_99, %c0_100] : memref<2x1x32xf32, #tpu.memory_space<vmem>>, vector<1x1x32xf32>
    %199 = vector.shape_cast %198 : vector<1x1x32xf32> to vector<1x32xf32>
    %cst_101 = arith.constant dense<0.000000e+00> : vector<16xf32>
    %200 = vector.multi_reduction <add>, %195, %cst_101 [1] : vector<16x32xf32> to vector<16xf32>
    %201 = vector.shape_cast %200 : vector<16xf32> to vector<16x1xf32>
    %cst_102 = arith.constant 3.200000e+01 : f32
    %202 = vector.broadcast %cst_102 : f32 to vector<16x1xf32>
    %203 = arith.divf %201, %202 : vector<16x1xf32>
    %204 = vector.broadcast %203 : vector<16x1xf32> to vector<16x32xf32>
    %205 = arith.subf %195, %204 : vector<16x32xf32>
    %206 = arith.mulf %205, %205 : vector<16x32xf32>
    %cst_103 = arith.constant dense<0.000000e+00> : vector<16xf32>
    %207 = vector.multi_reduction <add>, %206, %cst_103 [1] : vector<16x32xf32> to vector<16xf32>
    %208 = vector.shape_cast %207 : vector<16xf32> to vector<16x1xf32>
    %cst_104 = arith.constant 3.200000e+01 : f32
    %209 = vector.broadcast %cst_104 : f32 to vector<16x1xf32>
    %210 = arith.divf %208, %209 : vector<16x1xf32>
    %211 = vector.broadcast %203 : vector<16x1xf32> to vector<16x32xf32>
    %212 = arith.subf %195, %211 : vector<16x32xf32>
    %cst_105 = arith.constant 9.99999974E-6 : f32
    %213 = vector.broadcast %cst_105 : f32 to vector<16x1xf32>
    %214 = arith.addf %210, %213 : vector<16x1xf32>
    %215 = math.rsqrt %214 : vector<16x1xf32>
    %216 = vector.broadcast %215 : vector<16x1xf32> to vector<16x32xf32>
    %217 = arith.mulf %212, %216 : vector<16x32xf32>
    %218 = vector.broadcast %197 : vector<1x32xf32> to vector<16x32xf32>
    %219 = arith.mulf %217, %218 : vector<16x32xf32>
    %220 = vector.broadcast %199 : vector<1x32xf32> to vector<16x32xf32>
    %221 = arith.addf %219, %220 : vector<16x32xf32>
    %cst_106 = arith.constant 0.000000e+00 : f32
    %222 = vector.broadcast %cst_106 : f32 to vector<16x32xf32>
    %223 = arith.maximumf %221, %222 : vector<16x32xf32>
    %224 = arith.addf %123, %223 : vector<16x32xf32>
    %225 = vector.shape_cast %224 : vector<16x32xf32> to vector<2x8x32xf32>
    %226 = vector.extract_strided_slice %225 {offsets = [0, 7, 0], sizes = [2, 1, 32], strides = [1, 1, 1]} : vector<2x8x32xf32> to vector<2x1x32xf32>
    %c0_107 = arith.constant 0 : index
    %c0_108 = arith.constant 0 : index
    %c0_109 = arith.constant 0 : index
    %227 = vector.load %arg10[%c0_107, %c0_108, %c0_109] : memref<2x1x32xf32, #tpu.memory_space<vmem>>, vector<2x1x32xf32>
    tpu.vector_store %arg10[%c0_107, %c0_108, %c0_109], %226 {strides = array<i32>} : memref<2x1x32xf32, #tpu.memory_space<vmem>>, vector<2x1x32xf32>,
    return
  }
  func.func @transform_0(%arg0: i32) -> (i32, i32, i32) {
    %c0_i32 = arith.constant 0 : i32
    %c0_i32_0 = arith.constant 0 : i32
    %c0_i32_1 = arith.constant 0 : i32
    return %arg0, %c0_i32, %c0_i32_0 : i32, i32, i32
  }
  func.func @transform_1(%arg0: i32) -> (i32, i32, i32) {
    %c0_i32 = arith.constant 0 : i32
    %c0_i32_0 = arith.constant 0 : i32
    %c0_i32_1 = arith.constant 0 : i32
    %c0_i32_2 = arith.constant 0 : i32
    return %c0_i32, %c0_i32_0, %c0_i32_1 : i32, i32, i32
  }
  func.func @transform_2(%arg0: i32) -> (i32, i32, i32) {
    %c0_i32 = arith.constant 0 : i32
    %c0_i32_0 = arith.constant 0 : i32
    %c0_i32_1 = arith.constant 0 : i32
    %c0_i32_2 = arith.constant 0 : i32
    return %c0_i32, %c0_i32_0, %c0_i32_1 : i32, i32, i32
  }
  func.func @transform_3(%arg0: i32) -> (i32, i32, i32) {
    %c0_i32 = arith.constant 0 : i32
    %c0_i32_0 = arith.constant 0 : i32
    %c0_i32_1 = arith.constant 0 : i32
    %c0_i32_2 = arith.constant 0 : i32
    return %c0_i32, %c0_i32_0, %c0_i32_1 : i32, i32, i32
  }
  func.func @transform_4(%arg0: i32) -> (i32, i32, i32) {
    %c0_i32 = arith.constant 0 : i32
    %c0_i32_0 = arith.constant 0 : i32
    %c0_i32_1 = arith.constant 0 : i32
    %c0_i32_2 = arith.constant 0 : i32
    return %c0_i32, %c0_i32_0, %c0_i32_1 : i32, i32, i32
  }
  func.func @transform_5(%arg0: i32) -> (i32, i32, i32) {
    %c0_i32 = arith.constant 0 : i32
    %c0_i32_0 = arith.constant 0 : i32
    %c0_i32_1 = arith.constant 0 : i32
    %c0_i32_2 = arith.constant 0 : i32
    return %c0_i32, %c0_i32_0, %c0_i32_1 : i32, i32, i32
  }
  func.func @transform_6(%arg0: i32) -> (i32, i32, i32) {
    %c0_i32 = arith.constant 0 : i32
    %c0_i32_0 = arith.constant 0 : i32
    %c0_i32_1 = arith.constant 0 : i32
    %c0_i32_2 = arith.constant 0 : i32
    return %c0_i32, %c0_i32_0, %c0_i32_1 : i32, i32, i32
  }
  func.func @transform_7(%arg0: i32) -> (i32, i32, i32) {
    %c0_i32 = arith.constant 0 : i32
    %c0_i32_0 = arith.constant 0 : i32
    %c0_i32_1 = arith.constant 0 : i32
    %c0_i32_2 = arith.constant 0 : i32
    return %c0_i32, %c0_i32_0, %c0_i32_1 : i32, i32, i32
  }
  func.func @transform_8(%arg0: i32) -> (i32, i32, i32) {
    %c0_i32 = arith.constant 0 : i32
    %c0_i32_0 = arith.constant 0 : i32
    %c0_i32_1 = arith.constant 0 : i32
    %c0_i32_2 = arith.constant 0 : i32
    return %c0_i32, %c0_i32_0, %c0_i32_1 : i32, i32, i32
  }
  func.func @transform_9(%arg0: i32) -> (i32, i32, i32) {
    %c0_i32 = arith.constant 0 : i32
    %c0_i32_0 = arith.constant 0 : i32
    %c0_i32_1 = arith.constant 0 : i32
    return %arg0, %c0_i32, %c0_i32_0 : i32, i32, i32
  }
}

</mosaic_0001>

<bundles_post_ra>
// kernel: nextitnet_forward.1
= control target key start
LH: loop header
LB: loop body
LE: loop exit
PB: predicated region body
PF: predicated region fallthrough
CT: control target
= control target key end

     0   :  { %v33_v3 = vlaneseq  ;;  %vm93_vm1 = vcmask 261120   ;;  %s2194_s0 = inlined_call_operand.vmem [shape: f32[2,8,32], index: 0, kind: input, shape index: {}]   ;;  %s2195_s1 = inlined_call_operand.vmem [shape: f32[2,96,32], index: 1, kind: input, shape index: {}]   ;;  %s2196_s2 = inlined_call_operand.vmem [shape: f32[2,1,32], index: 2, kind: input, shape index: {}]   ;;  %s2197_s3 = inlined_call_operand.vmem [shape: f32[2,1,32], index: 3, kind: input, shape index: {}]   ;;  %s2198_s4 = inlined_call_operand.vmem [shape: f32[2,1,32], index: 4, kind: input, shape index: {}]   ;;  %s2199_s5 = inlined_call_operand.vmem [shape: f32[2,96,32], index: 5, kind: input, shape index: {}]   ;;  %s2200_s6 = inlined_call_operand.vmem [shape: f32[2,1,32], index: 6, kind: input, shape index: {}]   ;;  %s2201_s7 = inlined_call_operand.vmem [shape: f32[2,1,32], index: 7, kind: input, shape index: {}]   ;;  %s2202_s8 = inlined_call_operand.vmem [shape: f32[2,1,32], index: 8, kind: input, shape index: {}]   ;;  %s2203_s9 = inlined_call_operand.hbm [shape: f32[2,1,32], index: 9, kind: output, shape index: {}]  }
   0x1   :  { %v66_v0 = vld [vmem:[%s2195_s1 + $0x20] sm:$0xff]  ;;  %v67_v1 = vld [vmem:[%s2195_s1 + $0x28] sm:$0xff]  ;;  %v68_v2 = vld [vmem:[%s2195_s1 + $0x30] sm:$0xff] }
   0x2   :  { %v1659_v4 = vpack.c.bf16 %v67_v1, %v66_v0  ;;  %v69_v5 = vld [vmem:[%s2195_s1 + $0x38] sm:$0xff]  ;;  %v1884_v6 = vld [vmem:[%s2194_s0] sm:$0xff]  ;;  %v1889_v7 = vld [vmem:[%s2194_s0 + $0x8] sm:$0xff]  ;;  %v1891_v9 = vshrl.u32 %v33_v3, 7 }
   0x3   :  { %v1663_v8 = vpack.c.bf16 %v69_v5, %v68_v2  ;;  %v86_v10 = vrot.slane %v1884_v6, 7  ;;  %v87_v11 = vrot.slane %v1889_v7, 7  ;;  %v62_v12 = vld [vmem:[%s2195_s1] sm:$0xff]  ;;  %v63_v13 = vld [vmem:[%s2195_s1 + $0x8] sm:$0xff]  ;;  %v77_v14 = vrot.slane %v1884_v6, 6 }
   0x4   :  { %1660 = vmatprep.subr.bf16.mxu0 %v1659_v4  ;;  %v78_v15 = vrot.slane %v1889_v7, 6  ;;  %v1904_v16 = vand.u32 7, %v1891_v9  ;;  %vm88_vm0 = vcmp.lt.s32.totalorder %v1891_v9, 1  ;;  %v35_v17 = vadd.s32 8, %v1891_v9 }
   0x5   :  { %1662 = vmatpush3.bf16.msra.mxu0 %v1659_v4  ;;  %v90_v18 = vsel %vm88_vm0, %v87_v11, %v86_v10  ;;  %v89_v19 = vsel %vm88_vm0, %v86_v10, %v87_v11  ;;  %v1667_v20 = vpack.c.bf16 %v63_v13, %v62_v12  ;;  %vm79_vm2 = vcmp.lt.s32.totalorder %v1891_v9, 2 }
   0x6   :  { %1664 = vmatprep.subr.bf16.mxu0 %v1663_v8 }
   0x7   :  { %14 = vsyncpa [#allocation3], 0  ;;  %vm84_vm3 = vcmp.ge.s32.totalorder %v1904_v16, 1  ;;  %v1910_v21 = vand.u32 7, %v35_v17  ;;  %v64_v22 = vld [vmem:[%s2195_s1 + $0x10] sm:$0xff]  ;;  %v65_v23 = vld [vmem:[%s2195_s1 + $0x18] sm:$0xff]  ;;  %v81_v24 = vsel %vm79_vm2, %v78_v15, %v77_v14  ;;  %v80_v31 = vsel %vm79_vm2, %v77_v14, %v78_v15 }
   0x8   :  { %vm75_vm4 = vcmp.ge.s32.totalorder %v1904_v16, 2  ;;  %v91_v25 = vsel %vm84_vm3, %v90_v18, 0.0  ;;  %v1671_v27 = vpack.c.bf16 %v65_v23, %v64_v22  ;;  %v70_v29 = vld [vmem:[%s2195_s1 + $0x40] sm:$0xff]  ;;  %v71_v30 = vld [vmem:[%s2195_s1 + $0x48] sm:$0xff]  ;;  %v72_v33 = vld [vmem:[%s2195_s1 + $0x50] sm:$0xff]  ;;  %vm411_vm7 = vcmp.lt.s32.totalorder %v1891_v9, 4 }
   0x9   :  { %1666 = vmatpush3.bf16.msra.mxu0 %v1663_v8  ;;  %1535 = vmatprep.mubr.msk.f32.mxu0 %vm93_vm1, %v91_v25  ;;  %vm85_vm5 = vcmp.ge.s32.totalorder %v1910_v21, 1  ;;  %v82_v28 = vsel %vm75_vm4, %v81_v24, 0.0  ;;  %vm76_vm6 = vcmp.ge.s32.totalorder %v1910_v21, 2  ;;  %v1675_v32 = vpack.c.bf16 %v71_v30, %v70_v29  ;;  %v73_v34 = vld [vmem:[%s2195_s1 + $0x58] sm:$0xff]  ;;  %v1397_v37 = vld [vmem:[%s2196_s2] ss:$0 sm:$0xff] }
   0xa   :  { %v92_v26 = vsel %vm85_vm5, %v89_v19, 0.0  ;;  %1668 = vmatprep.subr.bf16.mxu0 %v1667_v20  ;;  %v83_v35 = vsel %vm76_vm6, %v80_v31, 0.0  ;;  %v1679_v36 = vpack.c.bf16 %v73_v34, %v72_v33  ;;  %v398_v54 = vld [vmem:[%s2199_s5 + $0x20] sm:$0xff]  ;;  %v399_v55 = vld [vmem:[%s2199_s5 + $0x28] sm:$0xff]  ;;  %v400_v56 = vld [vmem:[%s2199_s5 + $0x30] sm:$0xff]  ;;  %vm407_vm8 = vcmp.ge.s32.totalorder %v1904_v16, 4 }
   0xb   :  { %v1683_v57 = vpack.c.bf16 %v399_v55, %v398_v54  ;;  %v401_v58 = vld [vmem:[%s2199_s5 + $0x38] sm:$0xff]  ;;  %v394_v60 = vld [vmem:[%s2199_s5] sm:$0xff]  ;;  %v395_v61 = vld [vmem:[%s2199_s5 + $0x8] sm:$0xff]  ;;  %vm408_vm9 = vcmp.ge.s32.totalorder %v1910_v21, 4  ;;  %v1815_v9 = vmov 0.0   ;;  %s1816_s15 = smov [#allocation2]  }
   0xc   :  { %1536 = vmatmul.mubr.msk.f32.vlgmr.msra.gmra.mrb[0].mxu0 %vm93_vm1, %v92_v26  ;;  %v1687_v59 = vpack.c.bf16 %v401_v58, %v400_v56  ;;  %v1691_v62 = vpack.c.bf16 %v395_v61, %v394_v60  ;;  %v1398_v8 = vld [vmem:[%s2197_s3] ss:$0 sm:$0xff]  ;;  %v396_v26 = vld [vmem:[%s2199_s5 + $0x10] sm:$0xff]  ;;  %v1414_v61 = vld [vmem:[%s2195_s1 + $0x88] sm:$0xff]  ;;  %s1380_s16 = sshll.u32 %s1816_s15, 4  ;;  %vm1372_vm10 = vcmask 261127   ;;  %s1381_s16 = int_to_ptr.vmem [resolvable:$true] %s1380_s16 }
   0xd   :  { %1670 = vmatpush3.bf16.msra.mxu0 %v1667_v20  ;;  %1546 = vmatprep.mubr.msk.f32.mxu0 %vm93_vm1, %v82_v28  ;;  %v1399_v11 = vld [vmem:[%s2198_s4] ss:$0 sm:$0xff]  ;;  %v1443_v21 = vld [vmem:[%s2199_s5 + $0xb0] sm:$0xff]  ;;  %p1796_p1 = scmp.lt.s32.totalorder %s1381_s16, %s1381_s16 }
   0xe   :  { %1672 = vmatprep.subr.bf16.mxu0 %v1671_v27  ;;  %1684 = vmatprep.subr.bf16.mxu1 %v1683_v57  ;;  %v402_v34 = vld [vmem:[%s2199_s5 + $0x40] sm:$0xff] }
   0xf   :  { %1686 = vmatpush3.bf16.msra.mxu1 %v1683_v57  ;;  %v1413_v60 = vld [vmem:[%s2195_s1 + $0x80] sm:$0xff] }
  0x10   :  { %1688 = vmatprep.subr.bf16.mxu1 %v1687_v59 }
  0x11   :  { %1674 = vmatpush3.bf16.msra.mxu0 %v1671_v27  ;;  %v397_v27 = vld [vmem:[%s2199_s5 + $0x18] sm:$0xff] }
  0x12   :  { %1676 = vmatprep.subr.bf16.mxu0 %v1675_v32  ;;  %v1695_v33 = vpack.c.bf16 %v397_v27, %v396_v26 }
  0x13   :  { %1690 = vmatpush3.bf16.msra.mxu1 %v1687_v59 }
  0x14   :  { %1547 = vmatmul.mubr.msk.f32.vlgmr.msra.gmra.mrb[0].mxu0 %vm93_vm1, %v83_v35  ;;  %1692 = vmatprep.subr.bf16.mxu1 %v1691_v62  ;;  %v403_v35 = vld [vmem:[%s2199_s5 + $0x48] sm:$0xff] }
  0x15   :  { %1678 = vmatpush3.bf16.msra.mxu0 %v1675_v32  ;;  %1557 = vmatprep.mubr.msk.f32.mxu0 %vm93_vm1, %v1884_v6 }
  0x16   :  { %1680 = vmatprep.subr.bf16.mxu0 %v1679_v36 }
  0x19   :  { %1682 = vmatpush3.bf16.msra.mxu0 %v1679_v36 }
  0x1c   :  { %1558 = vmatmul.mubr.msk.f32.vlgmr.msra.gmra.mrb[0].mxu0 %vm93_vm1, %v1889_v7 }
  0xef   :  { %v1559_v38 = vpop.f32.mrb[0].mxu0 }
  0xf0   :  { %v328_v39 = vpop.f32.mrb[1].mxu0  ;;  %v346_v41 = vadd.f32 %v1559_v38, %v1397_v37  ;;  %v404_v38 = vld [vmem:[%s2199_s5 + $0x50] sm:$0xff] }
  0xf1   :  { %v345_v40 = vadd.f32 %v1397_v37, %v328_v39  ;;  %v1699_v37 = vpack.c.bf16 %v403_v35, %v402_v34  ;;  %v405_v39 = vld [vmem:[%s2199_s5 + $0x58] sm:$0xff]  ;;  %v1411_v34 = vld [vmem:[%s2195_s1 + $0x70] sm:$0xff] }
  0xf2   :  { %v352_v43 = vsel %vm93_vm1, %v346_v41, 0.0 }
  0xf3   :  { %v349_v42 = vsel %vm93_vm1, %v345_v40, 0.0 }
  0xf4   :  { %350 = vadd.xlane.f32.xlu0 %v349_v42 }
  0xf8   :  { %353 = vadd.xlane.f32.xlu0 %v352_v43  ;;  %v1406_v43 = vld [vmem:[%s2200_s6] ss:$0 sm:$0xff] }
 0x181   :  { %v351_v44 = vpop.xlane.xlu0 %350 }
 0x182   :  { %v356_v45 = vmul.f32 0.03125, %v351_v44 }
 0x184   :  { %v358_v46 = vsub.f32 %v345_v40, %v356_v45 }
 0x185   :  { %v354_v47 = vpop.xlane.xlu0 %353 }
 0x186   :  { %v357_v48 = vmul.f32 0.03125, %v354_v47  ;;  %v360_v49 = vmul.f32 %v358_v46, %v358_v46 }
 0x188   :  { %v359_v50 = vsub.f32 %v346_v41, %v357_v48  ;;  %v362_v51 = vsel %vm93_vm1, %v360_v49, 0.0  ;;  %v1703_v41 = vpack.c.bf16 %v405_v39, %v404_v38 }
 0x189   :  { %363 = vadd.xlane.f32.xlu1 %v362_v51 }
 0x18a   :  { %v361_v52 = vmul.f32 %v359_v50, %v359_v50 }
 0x18c   :  { %v365_v53 = vsel %vm93_vm1, %v361_v52, 0.0 }
 0x18d   :  { %366 = vadd.xlane.f32.xlu1 %v365_v53 }
 0x216   :  { %v364_v63 = vpop.xlane.xlu1 %363 }
 0x217   :  { %v368_v0 = vmul.f32 0.03125, %v364_v63  ;;  %v1415_v63 = vld [vmem:[%s2195_s1 + $0x90] sm:$0xff] }
 0x219   :  { %v370_v1 = vadd.f32 1e-05, %v368_v0  ;;  %v1416_v0 = vld [vmem:[%s2195_s1 + $0x98] sm:$0xff] }
 0x21a   :  { %v367_v2 = vpop.xlane.xlu1 %366 }
 0x21b   :  { %1775 = vrsqrt.f32 %v370_v1  ;;  %v369_v3 = vmul.f32 0.03125, %v367_v2  ;;  %v1711_v1 = vpack.c.bf16 %v1416_v0, %v1415_v63  ;;  %v1409_v2 = vld [vmem:[%s2195_s1 + $0x60] sm:$0xff] }
 0x21d   :  { %v371_v4 = vadd.f32 1e-05, %v369_v3  ;;  %v1410_v3 = vld [vmem:[%s2195_s1 + $0x68] sm:$0xff] }
 0x21f   :  { %1777 = vrsqrt.f32 %v371_v4  ;;  %v1715_v4 = vpack.c.bf16 %v1410_v3, %v1409_v2  ;;  %v1437_v2 = vld [vmem:[%s2199_s5 + $0x80] sm:$0xff]  ;;  %v1438_v3 = vld [vmem:[%s2199_s5 + $0x88] sm:$0xff] }
 0x225   :  { %v1776_v5 = vpop.eup %1775 }
 0x226   :  { %v374_v10 = vmul.f32 %v1776_v5, %v358_v46 }
 0x228   :  { %v382_v12 = vmul.f32 %v1398_v8, %v374_v10 }
 0x229   :  { %v1778_v13 = vpop.eup %1777 }
 0x22a   :  { %v375_v14 = vmul.f32 %v1778_v13, %v359_v50  ;;  %v390_v15 = vadd.f32 %v1399_v11, %v382_v12 }
 0x22c   :  { %v383_v17 = vmul.f32 %v1398_v8, %v375_v14  ;;  %v392_v19 = vmax.f32 %v390_v15, 0.0  ;;  %v1407_v15 = vld [vmem:[%s2201_s7] ss:$0 sm:$0xff] }
 0x22e   :  { %v391_v18 = vadd.f32 %v1399_v11, %v383_v17  ;;  %v416_v22 = vrot.slane %v392_v19, 6  ;;  %v409_v24 = vrot.slane %v392_v19, 4 }
 0x230   :  { %v393_v20 = vmax.f32 %v391_v18, 0.0 }
 0x232   :  { %v417_v23 = vrot.slane %v393_v20, 6  ;;  %v410_v25 = vrot.slane %v393_v20, 4 }
 0x234   :  { %v419_v28 = vsel %vm79_vm2, %v417_v23, %v416_v22  ;;  %v418_v29 = vsel %vm79_vm2, %v416_v22, %v417_v23  ;;  %v413_v30 = vsel %vm411_vm7, %v410_v25, %v409_v24  ;;  %v412_v40 = vsel %vm411_vm7, %v409_v24, %v410_v25 }
 0x235   :  { %v420_v31 = vsel %vm75_vm4, %v419_v28, 0.0  ;;  %v421_v32 = vsel %vm76_vm6, %v418_v29, 0.0  ;;  %v414_v36 = vsel %vm407_vm8, %v413_v30, 0.0  ;;  %v415_v42 = vsel %vm408_vm9, %v412_v40, 0.0  ;;  %v1417_v40 = vld [vmem:[%s2195_s1 + $0xa0] sm:$0xff] }
 0x236   :  { %1568 = vmatprep.mubr.msk.f32.mxu1 %vm93_vm1, %v420_v31 }
 0x237   :  { %1569 = vmatmul.mubr.msk.f32.vlgmr.msra.gmra.mrb[0].mxu1 %vm93_vm1, %v421_v32 }
 0x238   :  { %1694 = vmatpush3.bf16.msra.mxu1 %v1691_v62  ;;  %1579 = vmatprep.mubr.msk.f32.mxu1 %vm93_vm1, %v414_v36  ;;  %v1707_v62 = vpack.c.bf16 %v1414_v61, %v1413_v60 }
 0x239   :  { %1696 = vmatprep.subr.bf16.mxu1 %v1695_v33 }
 0x23a   :  { %1708 = vmatprep.subr.bf16.mxu0 %v1707_v62 }
 0x23b   :  { %1710 = vmatpush3.bf16.msra.mxu0 %v1707_v62 }
 0x23c   :  { %1698 = vmatpush3.bf16.msra.mxu1 %v1695_v33  ;;  %1712 = vmatprep.subr.bf16.mxu0 %v1711_v1 }
 0x23d   :  { %1700 = vmatprep.subr.bf16.mxu1 %v1699_v37 }
 0x23f   :  { %1580 = vmatmul.mubr.msk.f32.vlgmr.msra.gmra.mrb[0].mxu1 %vm93_vm1, %v415_v42  ;;  %1714 = vmatpush3.bf16.msra.mxu0 %v1711_v1 }
 0x240   :  { %1702 = vmatpush3.bf16.msra.mxu1 %v1699_v37  ;;  %1590 = vmatprep.mubr.msk.f32.mxu1 %vm93_vm1, %v392_v19  ;;  %v1408_v19 = vld [vmem:[%s2202_s8] ss:$0 sm:$0xff] }
 0x241   :  { %1704 = vmatprep.subr.bf16.mxu1 %v1703_v41  ;;  %1716 = vmatprep.subr.bf16.mxu0 %v1715_v4 }
 0x244   :  { %1706 = vmatpush3.bf16.msra.mxu1 %v1703_v41  ;;  %v1418_v41 = vld [vmem:[%s2195_s1 + $0xa8] sm:$0xff] }
 0x247   :  { %1591 = vmatmul.mubr.msk.f32.vlgmr.msra.gmra.mrb[0].mxu1 %vm93_vm1, %v393_v20 }
 0x31a   :  { %v1592_v44 = vpop.f32.mrb[0].mxu1 }
 0x31b   :  { %v674_v45 = vadd.f32 %v1592_v44, %v1406_v43  ;;  %v656_v46 = vpop.f32.mrb[1].mxu1  ;;  %v1419_v44 = vld [vmem:[%s2195_s1 + $0xb0] sm:$0xff] }
 0x31c   :  { %v673_v47 = vadd.f32 %v1406_v43, %v656_v46  ;;  %v1723_v43 = vpack.c.bf16 %v1418_v41, %v1417_v40 }
 0x31d   :  { %v680_v48 = vsel %vm93_vm1, %v674_v45, 0.0 }
 0x31e   :  { %681 = vadd.xlane.f32.xlu1 %v680_v48  ;;  %v677_v49 = vsel %vm93_vm1, %v673_v47, 0.0 }
 0x31f   :  { %678 = vadd.xlane.f32.xlu0 %v677_v49  ;;  %v1428_v49 = vld [vmem:[%s2196_s2 + $0x1] ss:$0 sm:$0xff] }
 0x3ab   :  { %v682_v50 = vpop.xlane.xlu1 %681 }
 0x3ac   :  { %v684_v51 = vmul.f32 0.03125, %v682_v50  ;;  %v679_v52 = vpop.xlane.xlu0 %678 }
 0x3ad   :  { %v683_v53 = vmul.f32 0.03125, %v679_v52 }
 0x3ae   :  { %v686_v54 = vsub.f32 %v674_v45, %v684_v51  ;;  %v1420_v45 = vld [vmem:[%s2195_s1 + $0xb8] sm:$0xff] }
 0x3af   :  { %v685_v55 = vsub.f32 %v673_v47, %v683_v53  ;;  %v1727_v47 = vpack.c.bf16 %v1420_v45, %v1419_v44  ;;  %v1442_v44 = vld [vmem:[%s2199_s5 + $0xa8] sm:$0xff]  ;;  %v1444_v45 = vld [vmem:[%s2199_s5 + $0xb8] sm:$0xff] }
 0x3b0   :  { %v688_v56 = vmul.f32 %v686_v54, %v686_v54 }
 0x3b1   :  { %v687_v57 = vmul.f32 %v685_v55, %v685_v55 }
 0x3b2   :  { %v692_v58 = vsel %vm93_vm1, %v688_v56, 0.0 }
 0x3b3   :  { %693 = vadd.xlane.f32.xlu1 %v692_v58  ;;  %v689_v59 = vsel %vm93_vm1, %v687_v57, 0.0 }
 0x3b4   :  { %690 = vadd.xlane.f32.xlu0 %v689_v59 }
 0x440   :  { %v694_v5 = vpop.xlane.xlu1 %693 }
 0x441   :  { %v696_v8 = vmul.f32 0.03125, %v694_v5  ;;  %v691_v10 = vpop.xlane.xlu0 %690  ;;  %v1731_v5 = vpack.c.bf16 %v1438_v3, %v1437_v2 }
 0x442   :  { %v695_v11 = vmul.f32 0.03125, %v691_v10 }
 0x443   :  { %v698_v12 = vadd.f32 1e-05, %v696_v8  ;;  %v1440_v8 = vld [vmem:[%s2199_s5 + $0x98] sm:$0xff]  ;;  %1732 = vmatprep.subr.bf16.mxu1 %v1731_v5 }
 0x444   :  { %v697_v13 = vadd.f32 1e-05, %v695_v11  ;;  %1734 = vmatpush3.bf16.msra.mxu1 %v1731_v5  ;;  %v1433_v11 = vld [vmem:[%s2199_s5 + $0x60] sm:$0xff] }
 0x445   :  { %1779 = vrsqrt.f32 %v698_v12  ;;  %v1434_v12 = vld [vmem:[%s2199_s5 + $0x68] sm:$0xff] }
 0x446   :  { %1781 = vrsqrt.f32 %v697_v13  ;;  %v1739_v13 = vpack.c.bf16 %v1434_v12, %v1433_v11 }
 0x44f   :  { %v1780_v14 = vpop.eup %1779 }
 0x450   :  { %v1782_v17 = vpop.eup %1781  ;;  %v702_v18 = vmul.f32 %v1780_v14, %v686_v54 }
 0x451   :  { %v701_v20 = vmul.f32 %v1782_v17, %v685_v55 }
 0x452   :  { %v710_v22 = vmul.f32 %v1407_v15, %v702_v18 }
 0x453   :  { %v709_v23 = vmul.f32 %v1407_v15, %v701_v20 }
 0x454   :  { %v718_v24 = vadd.f32 %v1408_v19, %v710_v22 }
 0x455   :  { %v717_v25 = vadd.f32 %v1408_v19, %v709_v23  ;;  %v1431_v23 = vld [vmem:[%s2197_s3 + $0x1] ss:$0 sm:$0xff] }
 0x456   :  { %v720_v26 = vmax.f32 %v718_v24, 0.0 }
 0x457   :  { %v719_v27 = vmax.f32 %v717_v25, 0.0 }
 0x458   :  { %v2055_v28 = vadd.f32 %v720_v26, %v1889_v7  ;;  %v1412_v7 = vld [vmem:[%s2195_s1 + $0x78] sm:$0xff] }
 0x459   :  { %v2058_v29 = vadd.f32 %v719_v27, %v1884_v6  ;;  %v1719_v39 = vpack.c.bf16 %v1412_v7, %v1411_v34  ;;  %v1432_v27 = vld [vmem:[%s2198_s4 + $0x1] ss:$0 sm:$0xff] }
 0x45a   :  { %v745_v30 = vrot.slane %v2055_v28, 6  ;;  %v739_v31 = vrot.slane %v2055_v28, 4 }
 0x45b   :  { %v744_v32 = vrot.slane %v2058_v29, 6  ;;  %v738_v33 = vrot.slane %v2058_v29, 4 }
 0x45d   :  { %v747_v6 = vsel %vm79_vm2, %v745_v30, %v744_v32  ;;  %v746_v35 = vsel %vm79_vm2, %v744_v32, %v745_v30  ;;  %v741_v36 = vsel %vm411_vm7, %v739_v31, %v738_v33  ;;  %v740_v46 = vsel %vm411_vm7, %v738_v33, %v739_v31 }
 0x45e   :  { %v748_v37 = vsel %vm75_vm4, %v747_v6, 0.0  ;;  %v749_v38 = vsel %vm76_vm6, %v746_v35, 0.0  ;;  %v742_v42 = vsel %vm407_vm8, %v741_v36, 0.0  ;;  %v743_v48 = vsel %vm408_vm9, %v740_v46, 0.0  ;;  %v1435_v36 = vld [vmem:[%s2199_s5 + $0x70] sm:$0xff] }
 0x45f   :  { %1601 = vmatprep.mubr.msk.f32.mxu0 %vm93_vm1, %v748_v37  ;;  %v1436_v37 = vld [vmem:[%s2199_s5 + $0x78] sm:$0xff]  ;;  %v1751_v46 = vpack.c.bf16 %v1444_v45, %v1443_v21 }
 0x460   :  { %1602 = vmatmul.mubr.msk.f32.vlgmr.msra.gmra.mrb[2].mxu0 %vm93_vm1, %v749_v38 }
 0x461   :  { %1718 = vmatpush3.bf16.msra.mxu0 %v1715_v4  ;;  %1612 = vmatprep.mubr.msk.f32.mxu0 %vm93_vm1, %v742_v42  ;;  %v1439_v4 = vld [vmem:[%s2199_s5 + $0x90] sm:$0xff]  ;;  %v1743_v42 = vpack.c.bf16 %v1436_v37, %v1435_v36 }
 0x462   :  { %1720 = vmatprep.subr.bf16.mxu0 %v1719_v39  ;;  %v1735_v10 = vpack.c.bf16 %v1440_v8, %v1439_v4 }
 0x464   :  { %1736 = vmatprep.subr.bf16.mxu1 %v1735_v10 }
 0x465   :  { %1722 = vmatpush3.bf16.msra.mxu0 %v1719_v39  ;;  %1738 = vmatpush3.bf16.msra.mxu1 %v1735_v10  ;;  %v1453_v10 = vld [vmem:[%s2201_s7 + $0x1] ss:$0 sm:$0xff]  ;;  %s1791_s7 = scalar_lea.vmem %s1381_s16, 32 }
 0x466   :  { %1724 = vmatprep.subr.bf16.mxu0 %v1723_v43  ;;  %1740 = vmatprep.subr.bf16.mxu1 %v1739_v13  ;;  %p1792_p0 = scmp.ne.s32.totalorder %s1381_s16, %s1791_s7  ;;  %p1797_p2 = scmp.lt.s32.totalorder %s1791_s7, %s1791_s7 }
 0x468   :  { %1613 = vmatmul.mubr.msk.f32.vlgmr.msra.gmra.mrb[2].mxu0 %vm93_vm1, %v743_v48  ;;  %p1798_p3 = por %p1797_p2, %p1796_p1 }
 0x469   :  { %1726 = vmatpush3.bf16.msra.mxu0 %v1723_v43  ;;  %1623 = vmatprep.mubr.msk.f32.mxu0 %vm93_vm1, %v2058_v29  ;;  %v1441_v43 = vld [vmem:[%s2199_s5 + $0xa0] sm:$0xff] }
 0x46a   :  { %1728 = vmatprep.subr.bf16.mxu0 %v1727_v47  ;;  %v1747_v16 = vpack.c.bf16 %v1442_v44, %v1441_v43  ;;  %p1799_p4 = pnand %p1798_p3, %p1792_p0 }
 0x46d   :  { %1730 = vmatpush3.bf16.msra.mxu0 %v1727_v47  ;;  %v1450_v47 = vld [vmem:[%s2200_s6 + $0x1] ss:$0 sm:$0xff] }
 0x470   :  { %1624 = vmatmul.mubr.msk.f32.vlgmr.msra.gmra.mrb[2].mxu0 %vm93_vm1, %v2055_v28 }
 0x543   :  { %v1625_v50 = vpop.f32.mrb[2].mxu0 }
 0x544   :  { %v1002_v51 = vadd.f32 %v1625_v50, %v1428_v49  ;;  %v984_v52 = vpop.f32.mrb[3].mxu0 }
 0x545   :  { %v1001_v53 = vadd.f32 %v1428_v49, %v984_v52 }
 0x546   :  { %v1010_v54 = vsel %vm93_vm1, %v1002_v51, 0.0 }
 0x547   :  { %1011 = vadd.xlane.f32.xlu1 %v1010_v54  ;;  %v1007_v55 = vsel %vm93_vm1, %v1001_v53, 0.0 }
 0x548   :  { %1008 = vadd.xlane.f32.xlu0 %v1007_v55 }
 0x5d4   :  { %v1012_v56 = vpop.xlane.xlu1 %1011 }
 0x5d5   :  { %v1014_v57 = vmul.f32 0.03125, %v1012_v56  ;;  %v1009_v58 = vpop.xlane.xlu0 %1008 }
 0x5d6   :  { %v1013_v59 = vmul.f32 0.03125, %v1009_v58 }
 0x5d7   :  { %v1016_v60 = vsub.f32 %v1002_v51, %v1014_v57 }
 0x5d8   :  { %v1015_v61 = vsub.f32 %v1001_v53, %v1013_v59 }
 0x5d9   :  { %v1018_v62 = vmul.f32 %v1016_v60, %v1016_v60 }
 0x5da   :  { %v1017_v63 = vmul.f32 %v1015_v61, %v1015_v61 }
 0x5db   :  { %v1022_v0 = vsel %vm93_vm1, %v1018_v62, 0.0 }
 0x5dc   :  { %1023 = vadd.xlane.f32.xlu1 %v1022_v0  ;;  %v1019_v1 = vsel %vm93_vm1, %v1017_v63, 0.0 }
 0x5dd   :  { %1020 = vadd.xlane.f32.xlu0 %v1019_v1 }
 0x669   :  { %v1024_v14 = vpop.xlane.xlu1 %1023 }
 0x66a   :  { %v1026_v15 = vmul.f32 0.03125, %v1024_v14  ;;  %v1021_v17 = vpop.xlane.xlu0 %1020  ;;  %v1454_v14 = vld [vmem:[%s2202_s8 + $0x1] ss:$0 sm:$0xff] }
 0x66b   :  { %v1025_v18 = vmul.f32 0.03125, %v1021_v17 }
 0x66c   :  { %v1028_v19 = vadd.f32 1e-05, %v1026_v15 }
 0x66d   :  { %v1027_v20 = vadd.f32 1e-05, %v1025_v18 }
 0x66e   :  { %1783 = vrsqrt.f32 %v1028_v19 }
 0x66f   :  { %1785 = vrsqrt.f32 %v1027_v20 }
 0x678   :  { %v1784_v22 = vpop.eup %1783 }
 0x679   :  { %v1786_v24 = vpop.eup %1785  ;;  %v1032_v25 = vmul.f32 %v1784_v22, %v1016_v60 }
 0x67a   :  { %v1031_v26 = vmul.f32 %v1786_v24, %v1015_v61 }
 0x67b   :  { %v1040_v30 = vmul.f32 %v1431_v23, %v1032_v25 }
 0x67c   :  { %v1039_v31 = vmul.f32 %v1431_v23, %v1031_v26 }
 0x67d   :  { %v1048_v32 = vadd.f32 %v1432_v27, %v1040_v30 }
 0x67e   :  { %v1047_v33 = vadd.f32 %v1432_v27, %v1039_v31 }
 0x67f   :  { %v1050_v34 = vmax.f32 %v1048_v32, 0.0 }
 0x680   :  { %v1049_v7 = vmax.f32 %v1047_v33, 0.0 }
 0x681   :  { %v1067_v6 = vrot.slane %v1050_v34, 4 }
 0x682   :  { %v1066_v35 = vrot.slane %v1049_v7, 4 }
 0x684   :  { %v1069_v38 = vsel %vm411_vm7, %v1067_v6, %v1066_v35  ;;  %v1068_v39 = vsel %vm411_vm7, %v1066_v35, %v1067_v6 }
 0x685   :  { %v1070_v40 = vsel %vm407_vm8, %v1069_v38, 0.0  ;;  %v1071_v41 = vsel %vm408_vm9, %v1068_v39, 0.0 }
 0x686   :  { %1634 = vmatprep.mubr.msk.f32.mxu1 %vm93_vm1, %v1070_v40 }
 0x687   :  { %1635 = vmatmul.mubr.msk.f32.vlgmr.msra.gmra.mrb[2].mxu1 %vm93_vm1, %v1071_v41 }
 0x688   :  { %1742 = vmatpush3.bf16.msra.mxu1 %v1739_v13  ;;  %1645 = vmatprep.mubr.f32.mxu1 %v1815_v9 }
 0x689   :  { %1744 = vmatprep.subr.bf16.mxu1 %v1743_v42 }
 0x68c   :  { %1746 = vmatpush3.bf16.msra.mxu1 %v1743_v42 }
 0x68d   :  { %1748 = vmatprep.subr.bf16.mxu1 %v1747_v16 }
 0x68f   :  { %1646 = vmatmul.mubr.f32.vlgmr.msra.gmra.mrb[2].mxu1 %v1815_v9 }
 0x690   :  { %1750 = vmatpush3.bf16.msra.mxu1 %v1747_v16  ;;  %1656 = vmatprep.mubr.msk.f32.mxu1 %vm93_vm1, %v1049_v7 }
 0x691   :  { %1752 = vmatprep.subr.bf16.mxu1 %v1751_v46 }
 0x694   :  { %1754 = vmatpush3.bf16.msra.mxu1 %v1751_v46 }
 0x697   :  { %1657 = vmatmul.mubr.msk.f32.vlgmr.msra.gmra.mrb[2].mxu1 %vm93_vm1, %v1050_v34 }
 0x76a   :  { %v1658_v48 = vpop.f32.mrb[2].mxu1 }
 0x76b   :  { %v1321_v49 = vadd.f32 %v1658_v48, %v1450_v47  ;;  %v1303_v50 = vpop.f32.mrb[3].mxu1 }
 0x76c   :  { %v1320_v51 = vadd.f32 %v1450_v47, %v1303_v50 }
 0x76d   :  { %v1329_v52 = vsel %vm93_vm1, %v1321_v49, 0.0 }
 0x76e   :  { %1330 = vadd.xlane.f32.xlu1 %v1329_v52  ;;  %v1326_v53 = vsel %vm93_vm1, %v1320_v51, 0.0 }
 0x76f   :  { %1327 = vadd.xlane.f32.xlu0 %v1326_v53 }
 0x7fb   :  { %v1331_v54 = vpop.xlane.xlu1 %1330 }
 0x7fc   :  { %v1333_v55 = vmul.f32 0.03125, %v1331_v54  ;;  %v1328_v56 = vpop.xlane.xlu0 %1327 }
 0x7fd   :  { %v1332_v57 = vmul.f32 0.03125, %v1328_v56 }
 0x7fe   :  { %v1335_v58 = vsub.f32 %v1321_v49, %v1333_v55 }
 0x7ff   :  { %v1334_v59 = vsub.f32 %v1320_v51, %v1332_v57 }
 0x800   :  { %v1337_v60 = vmul.f32 %v1335_v58, %v1335_v58 }
 0x801   :  { %v1336_v61 = vmul.f32 %v1334_v59, %v1334_v59 }
 0x802   :  { %v1341_v62 = vsel %vm93_vm1, %v1337_v60, 0.0 }
 0x803   :  { %1342 = vadd.xlane.f32.xlu1 %v1341_v62  ;;  %v1338_v63 = vsel %vm93_vm1, %v1336_v61, 0.0 }
 0x804   :  { %1339 = vadd.xlane.f32.xlu0 %v1338_v63 }
 0x890   :  { %v1343_v0 = vpop.xlane.xlu1 %1342 }
 0x891   :  { %v1345_v1 = vmul.f32 0.03125, %v1343_v0  ;;  %v1340_v2 = vpop.xlane.xlu0 %1339 }
 0x892   :  { %v1344_v3 = vmul.f32 0.03125, %v1340_v2 }
 0x893   :  { %v1347_v4 = vadd.f32 1e-05, %v1345_v1 }
 0x894   :  { %v1346_v5 = vadd.f32 1e-05, %v1344_v3 }
 0x895   :  { %1787 = vrsqrt.f32 %v1347_v4 }
 0x896   :  { %1789 = vrsqrt.f32 %v1346_v5 }
 0x89f   :  { %v1788_v8 = vpop.eup %1787 }
 0x8a0   :  { %v1790_v11 = vpop.eup %1789  ;;  %v1351_v12 = vmul.f32 %v1788_v8, %v1335_v58 }
 0x8a1   :  { %v1350_v13 = vmul.f32 %v1790_v11, %v1334_v59 }
 0x8a2   :  { %v1359_v15 = vmul.f32 %v1453_v10, %v1351_v12 }
 0x8a3   :  { %v1358_v17 = vmul.f32 %v1453_v10, %v1350_v13 }
 0x8a4   :  { %v1367_v18 = vadd.f32 %v1454_v14, %v1359_v15 }
 0x8a5   :  { %v1366_v19 = vadd.f32 %v1454_v14, %v1358_v17 }
 0x8a6   :  { %v1369_v20 = vmax.f32 %v1367_v18, 0.0 }
 0x8a7   :  { %v1368_v22 = vmax.f32 %v1366_v19, 0.0 }
 0x8a8   :  { %v1371_v23 = vadd.f32 %v1369_v20, %v2055_v28 }
 0x8a9   :  { %v1370_v24 = vadd.f32 %v1368_v22, %v2058_v29 }
 0x8aa   :  { %1374 = vst.msk [vmem:[#allocation2 - $0x6] sm:$0x80] %vm1372_vm10, %v1371_v23 }
 0x8ab   :  { %1373 = vst.msk [vmem:[#allocation2 - $0x7] sm:$0x80] %vm1372_vm10, %v1370_v24 }
 0x8ac   :  { %1802 = shalt.err (!%p1799_p4)
}
 0x8ad   :  { %s1803_s18 = scalar_lea.hbm %s2203_s9, 32 }
 0x8ae   :  { %p1804_p5 = scmp.ne.s32.totalorder %s2203_s9, %s1803_s18  ;;  %p1807_p6 = scmp.lt.u32.totalorder %s1803_s18, %s2203_s9 }
 0x8b0   :  { %p1809_p7 = pnand %p1807_p6, %p1804_p5 }
 0x8b2   :  { %1812 = shalt.err (!%p1809_p7)
}
 0x8b3   :  { %s1817_s23 = smov 16   ;;  %s1818_s24 = smov 1  }
 0x8b4   :  { %1386 = dma.vmem_to_hbm [thread:$0]  %s1381_s16, 32, %s2203_s9, [#allocation3], %s1817_s23, %s1817_s23, %s1818_s24  }
 0x8b5   :  { %1813 = dma.done.wait [#allocation3], 32  }
 0x8b6   :  { %1814 = vsyncadd [#allocation3], 4294967264 }
 0x8b7   :  { %1390 = vsyncpa [#allocation3], 1 }

</bundles_post_ra>
